<compile_context>
chip_gen: v7x
topology: tpu7x:2x2x1
jax: 0.10.0
libtpu: 0.0.40
codegen_flags: <defaults>
</compile_context>

<pallas_src>
import jax
import jax.numpy as jnp
from jax import lax
from jax.experimental import pallas as pl
from jax.experimental.pallas import tpu as pltpu

LANE = 128  # TPU vreg lane width


def _round_up(x, m):
    return ((x + m - 1) // m) * m


def _make_single_pass_kernel(tk, p_valid):
    """Whole (lane-padded) parameter vector fits in one K tile."""

    def kernel(j_ref, p_ref, o_ref):
        j = j_ref[...]
        if p_valid is not None:
            # Mask garbage columns read past the ragged end of J's last dim.
            col = lax.broadcasted_iota(jnp.int32, (1, tk), 1)
            j = jnp.where(col < p_valid, j, 0)
        o_ref[...] = jnp.dot(
            j, p_ref[...], preferred_element_type=jnp.float32
        ).astype(o_ref.dtype)

    return kernel


def _make_tiled_kernel(tk, p_valid):
    """K axis tiled; f32 accumulator in VMEM scratch; one MXU dot per tile."""

    def kernel(j_ref, p_ref, o_ref, acc_ref):
        k = pl.program_id(1)

        @pl.when(k == 0)
        def _():
            acc_ref[...] = jnp.zeros_like(acc_ref)

        j = j_ref[...]
        if p_valid is not None:
            # Global column index of this K tile; zero out the ragged tail.
            col = k * tk + lax.broadcasted_iota(jnp.int32, (1, tk), 1)
            j = jnp.where(col < p_valid, j, 0)
        acc_ref[...] += jnp.dot(j, p_ref[...], preferred_element_type=jnp.float32)

        @pl.when(k == pl.num_programs(1) - 1)
        def _():
            o_ref[...] = acc_ref[...].astype(o_ref.dtype)

    return kernel


def parallel_calc_gp_function(J, nn_params, *, tm=128, max_tk=8192,
                              vmem_limit_bytes=None):
    """Computes einsum('ij,j->i', J, nn_params) with a Pallas TPU kernel."""
    N, P = J.shape
    assert nn_params.shape == (P,)
    out_dtype = jnp.result_type(J.dtype, nn_params.dtype)

    # ---- tile-size selection -------------------------------------------------
    tm_eff = max(8, (tm // 8) * 8)
    tm_eff = min(tm_eff, _round_up(N, 8))
    # v7x megacore: ensure >= 2 row tiles when N allows it so both TensorCores
    # get work (one extra, cheap grid step on single-TC v5e/v6e).
    if N > 8 and pl.cdiv(N, tm_eff) == 1:
        tm_eff = _round_up(-(-N // 2), 8)

    tk_cap = max(LANE, (max_tk // LANE) * LANE)
    tk = min(tk_cap, _round_up(P, LANE))     # collapse K axis if P fits
    grid_m = pl.cdiv(N, tm_eff)
    grid_k = pl.cdiv(P, tk)

    # Ragged K tail: J's out-of-bounds columns are masked to zero in-kernel and
    # the (tiny) parameter vector is zero-padded, so the tail contributes 0.
    p_valid = P if (P % tk) != 0 else None
    Pp = grid_k * tk
    if Pp != P:
        nn_params = jnp.pad(nn_params, (0, Pp - P))
    params_col = nn_params.reshape(Pp, 1)    # (K, 1) column operand for the MXU

    # ---- VMEM budget sized from the actual footprint (v7x has only 64 MiB) --
    if vmem_limit_bytes is None:
        j_isz = jnp.dtype(J.dtype).itemsize
        p_isz = jnp.dtype(params_col.dtype).itemsize
        footprint = (2 * tm_eff * tk * j_isz   # double-buffered J tile
                     + 2 * tk * p_isz          # double-buffered params tile
                     + 3 * tm_eff * 4)         # output blocks + f32 accumulator
        vmem_limit_bytes = int(min(max(footprint + footprint // 4 + (2 << 20),
                                       8 << 20), 96 << 20))

    if grid_k == 1:
        # Single streaming pass over J: no accumulator scratch, no pl.when.
        kernel = _make_single_pass_kernel(tk, p_valid)
        grid = (grid_m,)
        in_specs = [
            pl.BlockSpec((tm_eff, tk), lambda i: (i, 0)),   # J row tile
            pl.BlockSpec((tk, 1), lambda i: (0, 0)),        # full params column
        ]
        out_specs = pl.BlockSpec((tm_eff, 1), lambda i: (i, 0))
        scratch_shapes = []
        dim_sem = ("parallel",)
    else:
        kernel = _make_tiled_kernel(tk, p_valid)
        grid = (grid_m, grid_k)
        in_specs = [
            pl.BlockSpec((tm_eff, tk), lambda i, k: (i, k)),  # J tile
            pl.BlockSpec((tk, 1), lambda i, k: (k, 0)),       # params K tile
        ]
        out_specs = pl.BlockSpec((tm_eff, 1), lambda i, k: (i, 0))
        scratch_shapes = [pltpu.VMEM((tm_eff, 1), jnp.float32)]
        dim_sem = ("parallel", "arbitrary")

    out = pl.pallas_call(
        kernel,
        out_shape=jax.ShapeDtypeStruct((N, 1), out_dtype),
        grid_spec=pltpu.PrefetchScalarGridSpec(
            num_scalar_prefetch=0,
            grid=grid,
            in_specs=in_specs,
            out_specs=out_specs,
            scratch_shapes=scratch_shapes,
        ),
        compiler_params=pltpu.CompilerParams(
            dimension_semantics=dim_sem,
            vmem_limit_bytes=vmem_limit_bytes,
        ),
    )(J, params_col)

    return out.reshape(N)


if __name__ == "__main__":
    key = jax.random.PRNGKey(0)
    k_j, k_p, k_j2, k_p2 = jax.random.split(key, 4)

    # Case 1: params fit in one K tile -> single streaming pass (no scratch).
    N, P = 256, 256
    J = jax.random.normal(k_j, (N, P), dtype=jnp.float32)
    nn_params = jax.random.normal(k_p, (P,), dtype=jnp.float32)
    y = jax.block_until_ready(parallel_calc_gp_function(J, nn_params))
    y_ref = jnp.einsum("ij,j->i", J, nn_params,
                       precision=jax.lax.Precision.HIGHEST)
    assert y.shape == (N,)
    assert jnp.allclose(y, y_ref, atol=5e-3, rtol=5e-3), "case 1 mismatch"

    # Case 2: ragged N and P with a multi-tile reduction axis (exercises the
    # in-kernel tail mask, discarded OOB output rows, and the f32 accumulator).
    N2, P2 = 300, 1000
    J2 = jax.random.normal(k_j2, (N2, P2), dtype=jnp.float32)
    p2 = jax.random.normal(k_p2, (P2,), dtype=jnp.float32)
    y2 = jax.block_until_ready(parallel_calc_gp_function(J2, p2, max_tk=512))
    y2_ref = jnp.einsum("ij,j->i", J2, p2,
                        precision=jax.lax.Precision.HIGHEST)
    assert y2.shape == (N2,)
    assert jnp.allclose(y2, y2_ref, atol=5e-3, rtol=5e-3), "case 2 mismatch"

    print("KERNEL_OK")
</pallas_src>

<mosaic_0001>
module attributes {stable_mosaic.version = 11 : i64} {
  func.func @kernel(%arg0: i32, %arg1: memref<128x256xf32, #tpu.memory_space<vmem>>, %arg2: memref<256x1xf32, #tpu.memory_space<vmem>>, %arg3: memref<128x1xf32, #tpu.memory_space<vmem>>) attributes {dimension_semantics = [#tpu.dimension_semantics<parallel>], iteration_bounds = array<i64: 2>, scalar_prefetch = 0 : i64, scratch_operands = 0 : i64, tpu.core_type = #tpu.core_type<tc>, window_params = [{transform_indices = @transform_0, window_bounds = array<i64: 128, 256>}, {pipeline_mode = #tpu.pipeline_mode<synchronous>, transform_indices = @transform_1, window_bounds = array<i64: 256, 1>}, {transform_indices = @transform_2, window_bounds = array<i64: 128, 1>}]} {
    %c0 = arith.constant 0 : index
    %c0_0 = arith.constant 0 : index
    %0 = vector.load %arg1[%c0, %c0_0] : memref<128x256xf32, #tpu.memory_space<vmem>>, vector<128x256xf32>
    %c0_1 = arith.constant 0 : index
    %c0_2 = arith.constant 0 : index
    %1 = vector.load %arg2[%c0_1, %c0_2] : memref<256x1xf32, #tpu.memory_space<vmem>>, vector<256x1xf32>
    %cst = arith.constant dense<0.000000e+00> : vector<128x1xf32>
    %2 = tpu.matmul %0, %1, %cst {dimension_numbers = #tpu.dot_dimension_numbers<[1], [0], [0], [1], [0, 0, 1, 1], [], []>} : vector<128x256xf32>, vector<256x1xf32>, vector<128x1xf32> -> vector<128x1xf32>
    %c0_3 = arith.constant 0 : index
    %c0_4 = arith.constant 0 : index
    %3 = vector.load %arg3[%c0_3, %c0_4] : memref<128x1xf32, #tpu.memory_space<vmem>>, vector<128x1xf32>
    tpu.vector_store %arg3[%c0_3, %c0_4], %2 {strides = array<i32>} : memref<128x1xf32, #tpu.memory_space<vmem>>, vector<128x1xf32>,
    return
  }
  func.func @transform_0(%arg0: i32) -> (i32, i32) {
    %c0_i32 = arith.constant 0 : i32
    %c0_i32_0 = arith.constant 0 : i32
    return %arg0, %c0_i32 : i32, i32
  }
  func.func @transform_1(%arg0: i32) -> (i32, i32) {
    %c0_i32 = arith.constant 0 : i32
    %c0_i32_0 = arith.constant 0 : i32
    %c0_i32_1 = arith.constant 0 : i32
    return %c0_i32, %c0_i32_0 : i32, i32
  }
  func.func @transform_2(%arg0: i32) -> (i32, i32) {
    %c0_i32 = arith.constant 0 : i32
    %c0_i32_0 = arith.constant 0 : i32
    return %arg0, %c0_i32 : i32, i32
  }
}

</mosaic_0001>

<bundles_post_ra>
// kernel: tpu_custom_call.1
= control target key start
LH: loop header
LB: loop body
LE: loop exit
PB: predicated region body
PF: predicated region fallthrough
CT: control target
= control target key end

     0   :  { %7 = vsyncpa [#allocation3], 0  ;;  %s1000_s0 = inlined_call_operand.hbm [shape: f32[256,256], index: 0, kind: input, shape index: {}]   ;;  %s1001_s1 = inlined_call_operand.vmem [shape: f32[256,1], index: 1, kind: input, shape index: {}]   ;;  %s1002_s2 = inlined_call_operand.vmem [shape: f32[256,1], index: 2, kind: output, shape index: {}]  }
   0x1   :  { %9 = vsyncpa [#allocation3 + $0x1], 0  ;;  %s729_s9 = smov 0   ;;  %s731_s10 = smov 0  }
   0x2   :  { %s733_s11 = smov 0   ;;  %s735_s12 = smov 0  }
   0x3 LB: > { %s460_s13 = sadd.s32 4294967295, %s709_s12   ;;  %s749_s14 = sadd.s32 1, %s709_s12   ;;  %s709_s12 = sphi %s735_s12, %s1009_s12   ;;  %s705_s11 = sphi %s733_s11, %s1008_s11   ;;  %s701_s10 = sphi %s731_s10, %s1007_s10   ;;  %s697_s9 = sphi %s729_s9, %s1006_s9  }
   0x4   : > { %s19_s15 = ssub.s32 %s709_s12, %s749_s14  ;;  %s22_s16 = sadd.s32 1, %s705_s11 }
   0x5   : > { %p20_p0 = scmp.eq.s32.totalorder %s19_s15, 0  ;;  %p29_p1 = scmp.ne.s32.totalorder %s705_s11, %s701_s10 }
   0x6   : > { %p30_p2 = scmp.eq.s32.totalorder %s709_s12, 0  ;;  %p35_p3 = scmp.ne.s32.totalorder %s701_s10, %s697_s9 }
   0x7   : > { %s759_s17 = scalar_select %p20_p0, %s705_s11, %s22_s16  }
   0x8   : > { %p31_p4 = por %p30_p2, %p29_p1  ;;  %p36_p5 = scmp.eq.s32.totalorder %s460_s13, 0 }
   0x9   : > { %p610_p6 = scmp.lt.s32.totalorder %s709_s12, 2  ;;  %s109_s19 = sand.u32 1, %s705_s11  }
   0xa   : > { %p764_p7 = por %p36_p5, %p35_p3  ;;  %s464_s20 = sshll.u32 %s109_s19, 8 }
   0xb   : > { %s475_s21 = sshll.u32 %s709_s12, 12  ;;  %s113_s25 = scalar_lea.vmem [#allocation2], %s464_s20 }
   0xc   : > { %s773_s24 = scalar_lea.hbm %s1000_s0, %s475_s21  ;;  %s121_s26 = sshll.u32 %s113_s25, 4  ;;  %s775_s26 = int_to_ptr.vmem [resolvable:$true] %s121_s26 }
   0xd   : > { %p777_p8 = pnand %p610_p6, %p31_p4  ;;  %s782_s28 = scalar_lea.sflag [#allocation3], %s109_s19 }
   0xe   : > { %s645_s29 = scalar_lea.hbm %s773_s24, 4096  ;;  %s650_s4 = scalar_lea.hbm %s1000_s0, 8192 }
   0xf   : > { %p646_p10 = scmp.ne.s32.totalorder %s773_s24, %s645_s29  ;;  %p647_p11 = pneg %p777_p8 }
  0x10   : > { %p651_p0 = scmp.lt.u32.totalorder %s773_s24, %s1000_s0  ;;  %p652_p1 = scmp.lt.u32.totalorder %s650_s4, %s645_s29 }
  0x11   : > { %p648_p12 = pnand %p647_p11, %p646_p10  ;;  %p654_p3 = scmp.lt.u32.totalorder %s645_s29, %s773_s24 }
  0x12   : > { %p653_p2 = por %p652_p1, %p651_p0 }
  0x13   : > { %p649_p13 = pneg %p648_p12 }
  0x14   : > { %p655_p4 = por %p654_p3, %p653_p2 }
  0x16   : > { %p656_p5 = pnand %p655_p4, %p649_p13 }
  0x18   : > { %659 = shalt.err (!%p656_p5)
}
  0x19   : > { %s660_s7 = scalar_lea.vmem %s775_s26, 4096  ;;  %s711_s8 = smov [#allocation2]  }
  0x1a   : > { %p661_p6 = scmp.ne.s32.totalorder %s775_s26, %s660_s7  ;;  %s665_s9 = sshll.u32 %s711_s8, 4  ;;  %s666_s9 = int_to_ptr.vmem [resolvable:$false] %s665_s9 }
  0x1b   : > { %s667_s15 = scalar_lea.vmem %s666_s9, 8192  ;;  %p668_p9 = scmp.lt.s32.totalorder %s775_s26, %s666_s9 }
  0x1c   : > { %p663_p10 = pnand %p661_p6, %p647_p11  ;;  %p669_p0 = scmp.lt.s32.totalorder %s667_s15, %s660_s7 }
  0x1e   : > { %p664_p12 = pneg %p663_p10  ;;  %p670_p1 = por %p669_p0, %p668_p9 }
  0x20   : > { %p671_p2 = pnand %p670_p1, %p664_p12 }
  0x22   : > { %674 = shalt.err (!%p671_p2)
}
  0x23   : > { %s712_s16 = smov 256   ;;  %s713_s19 = smov 16  }
  0x24   : > { %609 = dma.hbm_to_vmem [thread:$0]  (!%p777_p8), %s773_s24, 4096, %s775_s26, %s782_s28, %s712_s16, %s712_s16, %s713_s19  }
  0x25   : > { %p129_p11 = scmp.lt.s32.totalorder %s709_s12, 3  ;;  %p1005_p13 = scmp.ge.s32.totalorder %s709_s12, 1 }
  0x27   : > { %p130_p3 = pnand %p1005_p13, %p129_p11 }
  0x28   : > { %s135_s20 = sand.u32 (!%p130_p3), 1, %s701_s10  }
  0x29   : > { %133 = sbr.rel (%p130_p3) target bundleno = 328 (0x148), region = 28  ;;  %s469_s21 = sshll.u32 (!%p130_p3), %s135_s20, 8 }
  0x2a   : > { %s136_s22 = scalar_lea.sflag (!%p130_p3), [#allocation3], %s135_s20  ;;  %s814_s23 = scalar_lea.vmem (!%p130_p3), [#allocation2], %s469_s21 }
  0x30   : > { %692 = dma.done.wait (%p764_p7), %s136_s22, 4096  }
  0x31   : > { %694 = vsyncadd (%p764_p7), %s136_s22, 4294963200  ;;  %v215_v0 = vld [vmem:[%s1001_s1 + $0x80] sm:$0xff]  ;;  %v216_v1 = vld [vmem:[%s1001_s1 + $0x88] sm:$0xff]  ;;  %s470_s29 = sshll.u32 %s460_s13, 4  ;;  %vm376_vm0 = vcmask 7168  }
  0x32   : > { %v199_v2 = vld [vmem:[%s1001_s1] sm:$0xff]  ;;  %v556_v3 = vpack.c.bf16 %v216_v1, %v215_v0  ;;  %v200_v4 = vld [vmem:[%s1001_s1 + $0x8] sm:$0xff]  ;;  %v217_v5 = vld [vmem:[%s1001_s1 + $0x90] sm:$0xff]  ;;  %p162_p7 = scmp.lt.s32.totalorder %s470_s29, 31 }
  0x33   : > { %v218_v6 = vld [vmem:[%s1001_s1 + $0x98] sm:$0xff]  ;;  %v558_v7 = vpack.c.bf16 %v200_v4, %v199_v2  ;;  %v201_v9 = vld [vmem:[%s1001_s1 + $0x10] sm:$0xff]  ;;  %v219_v11 = vld [vmem:[%s1001_s1 + $0xa0] sm:$0xff] }
  0x34   : > { %v560_v8 = vpack.c.bf16 %v218_v6, %v217_v5  ;;  %v202_v10 = vld [vmem:[%s1001_s1 + $0x18] sm:$0xff]  ;;  %557 = vmatprep.subr.bf16.mxu0 %v556_v3  ;;  %588 = vmatprep.subr.bf16.mxu1 %v556_v3  ;;  %v220_v12 = vld [vmem:[%s1001_s1 + $0xa8] sm:$0xff]  ;;  %v203_v15 = vld [vmem:[%s1001_s1 + $0x20] sm:$0xff]  ;;  %s1011_s29 = smov (!%p162_p7, %s470_s29), 31 }
  0x35   : > { %559 = vmatpush3.bf16.msra.mxu0 %v558_v7  ;;  %596 = vmatpush3.bf16.msra.mxu1 %v558_v7  ;;  %v562_v13 = vpack.c.bf16 %v202_v10, %v201_v9  ;;  %v564_v14 = vpack.c.bf16 %v220_v12, %v219_v11  ;;  %v204_v16 = vld [vmem:[%s1001_s1 + $0x28] sm:$0xff]  ;;  %v221_v17 = vld [vmem:[%s1001_s1 + $0xb0] sm:$0xff]  ;;  %v222_v18 = vld [vmem:[%s1001_s1 + $0xb8] sm:$0xff]  ;;  %s471_s24 = sshll.u32 %s1011_s29, 3 }
  0x36   : > { %561 = vmatprep.subr.bf16.mxu0 %v560_v8  ;;  %589 = vmatprep.subr.bf16.mxu1 %v560_v8  ;;  %v566_v19 = vpack.c.bf16 %v204_v16, %v203_v15  ;;  %v568_v20 = vpack.c.bf16 %v222_v18, %v221_v17  ;;  %v205_v21 = vld [vmem:[%s1001_s1 + $0x30] sm:$0xff]  ;;  %v206_v22 = vld [vmem:[%s1001_s1 + $0x38] sm:$0xff]  ;;  %v223_v23 = vld [vmem:[%s1001_s1 + $0xc0] sm:$0xff]  ;;  %s953_s28 = scalar_lea.vmem %s1002_s2, %s471_s24 }
  0x37   : > { %v224_v24 = vld [vmem:[%s1001_s1 + $0xc8] sm:$0xff]  ;;  %v570_v27 = vpack.c.bf16 %v206_v22, %v205_v21  ;;  %v207_v29 = vld [vmem:[%s1001_s1 + $0x40] sm:$0xff]  ;;  %v225_v31 = vld [vmem:[%s1001_s1 + $0xd0] sm:$0xff] }
  0x38   : > { %v168_v25 = vld [vmem:[%s814_s23 + $0x8] sm:$0xff]  ;;  %v572_v28 = vpack.c.bf16 %v224_v24, %v223_v23  ;;  %v226_v32 = vld [vmem:[%s1001_s1 + $0xd8] sm:$0xff]  ;;  %v209_v35 = vld [vmem:[%s1001_s1 + $0x50] sm:$0xff] }
  0x39   : > { %563 = vmatpush3.bf16.msra.mxu0 %v562_v13  ;;  %597 = vmatpush3.bf16.msra.mxu1 %v562_v13  ;;  %v184_v26 = vld [vmem:[%s814_s23 + $0x88] sm:$0xff]  ;;  %v576_v34 = vpack.c.bf16 %v226_v32, %v225_v31  ;;  %v210_v36 = vld [vmem:[%s1001_s1 + $0x58] sm:$0xff]  ;;  %v227_v37 = vld [vmem:[%s1001_s1 + $0xe0] sm:$0xff] }
  0x3a   : > { %565 = vmatprep.subr.bf16.mxu0 %v564_v14  ;;  %590 = vmatprep.subr.bf16.mxu1 %v564_v14  ;;  %v208_v30 = vld [vmem:[%s1001_s1 + $0x48] sm:$0xff]  ;;  %v578_v39 = vpack.c.bf16 %v210_v36, %v209_v35  ;;  %v211_v41 = vld [vmem:[%s1001_s1 + $0x60] sm:$0xff]  ;;  %v229_v43 = vld [vmem:[%s1001_s1 + $0xf0] sm:$0xff] }
  0x3b   : > { %295 = vmatprep.mubr.f32.mxu0 %v168_v25  ;;  %335 = vmatprep.mubr.f32.mxu1 %v184_v26  ;;  %v574_v33 = vpack.c.bf16 %v208_v30, %v207_v29  ;;  %v228_v38 = vld [vmem:[%s1001_s1 + $0xe8] sm:$0xff]  ;;  %v230_v44 = vld [vmem:[%s1001_s1 + $0xf8] sm:$0xff]  ;;  %v213_v47 = vld [vmem:[%s1001_s1 + $0x70] sm:$0xff] }
  0x3c   : > { %v580_v40 = vpack.c.bf16 %v228_v38, %v227_v37  ;;  %v212_v42 = vld [vmem:[%s1001_s1 + $0x68] sm:$0xff]  ;;  %v584_v46 = vpack.c.bf16 %v230_v44, %v229_v43  ;;  %v214_v48 = vld [vmem:[%s1001_s1 + $0x78] sm:$0xff]  ;;  %v167_v50 = vld [vmem:[%s814_s23] sm:$0xff] }
  0x3d   : > { %567 = vmatpush3.bf16.msra.mxu0 %v566_v19  ;;  %598 = vmatpush3.bf16.msra.mxu1 %v566_v19  ;;  %v582_v45 = vpack.c.bf16 %v212_v42, %v211_v41  ;;  %v586_v49 = vpack.c.bf16 %v214_v48, %v213_v47  ;;  %v183_v51 = vld [vmem:[%s814_s23 + $0x80] sm:$0xff]  ;;  %v170_v52 = vld [vmem:[%s814_s23 + $0x18] sm:$0xff]  ;;  %v169_v54 = vld [vmem:[%s814_s23 + $0x10] sm:$0xff] }
  0x3e   : > { %569 = vmatprep.subr.bf16.mxu0 %v568_v20  ;;  %591 = vmatprep.subr.bf16.mxu1 %v568_v20  ;;  %v186_v53 = vld [vmem:[%s814_s23 + $0x98] sm:$0xff]  ;;  %v185_v55 = vld [vmem:[%s814_s23 + $0x90] sm:$0xff]  ;;  %v172_v56 = vld [vmem:[%s814_s23 + $0x28] sm:$0xff] }
  0x3f   : > { %v188_v57 = vld [vmem:[%s814_s23 + $0xa8] sm:$0xff]  ;;  %v171_v58 = vld [vmem:[%s814_s23 + $0x20] sm:$0xff]  ;;  %v174_v60 = vld [vmem:[%s814_s23 + $0x38] sm:$0xff] }
  0x40   : > { %v187_v59 = vld [vmem:[%s814_s23 + $0xa0] sm:$0xff]  ;;  %v190_v61 = vld [vmem:[%s814_s23 + $0xb8] sm:$0xff]  ;;  %v173_v62 = vld [vmem:[%s814_s23 + $0x30] sm:$0xff] }
  0x41   : > { %571 = vmatpush3.bf16.msra.mxu0 %v570_v27  ;;  %599 = vmatpush3.bf16.msra.mxu1 %v570_v27  ;;  %v189_v63 = vld [vmem:[%s814_s23 + $0xb0] sm:$0xff]  ;;  %v176_v0 = vld [vmem:[%s814_s23 + $0x48] sm:$0xff]  ;;  %v175_v2 = vld [vmem:[%s814_s23 + $0x40] sm:$0xff] }
  0x42   : > { %573 = vmatprep.subr.bf16.mxu0 %v572_v28  ;;  %592 = vmatprep.subr.bf16.mxu1 %v572_v28  ;;  %v192_v1 = vld [vmem:[%s814_s23 + $0xc8] sm:$0xff]  ;;  %v191_v3 = vld [vmem:[%s814_s23 + $0xc0] sm:$0xff]  ;;  %v178_v4 = vld [vmem:[%s814_s23 + $0x58] sm:$0xff] }
  0x43   : > { %v194_v5 = vld [vmem:[%s814_s23 + $0xd8] sm:$0xff]  ;;  %v177_v6 = vld [vmem:[%s814_s23 + $0x50] sm:$0xff]  ;;  %v180_v8 = vld [vmem:[%s814_s23 + $0x68] sm:$0xff] }
  0x44   : > { %v193_v7 = vld [vmem:[%s814_s23 + $0xd0] sm:$0xff]  ;;  %v196_v9 = vld [vmem:[%s814_s23 + $0xe8] sm:$0xff]  ;;  %v179_v10 = vld [vmem:[%s814_s23 + $0x60] sm:$0xff] }
  0x45   : > { %575 = vmatpush3.bf16.msra.mxu0 %v574_v33  ;;  %600 = vmatpush3.bf16.msra.mxu1 %v574_v33  ;;  %v195_v11 = vld [vmem:[%s814_s23 + $0xe0] sm:$0xff]  ;;  %v182_v12 = vld [vmem:[%s814_s23 + $0x78] sm:$0xff]  ;;  %v181_v14 = vld [vmem:[%s814_s23 + $0x70] sm:$0xff] }
  0x46   : > { %577 = vmatprep.subr.bf16.mxu0 %v576_v34  ;;  %593 = vmatprep.subr.bf16.mxu1 %v576_v34  ;;  %v198_v13 = vld [vmem:[%s814_s23 + $0xf8] sm:$0xff]  ;;  %v197_v15 = vld [vmem:[%s814_s23 + $0xf0] sm:$0xff] }
  0x49   : > { %579 = vmatpush3.bf16.msra.mxu0 %v578_v39  ;;  %601 = vmatpush3.bf16.msra.mxu1 %v578_v39 }
  0x4a   : > { %581 = vmatprep.subr.bf16.mxu0 %v580_v40  ;;  %594 = vmatprep.subr.bf16.mxu1 %v580_v40 }
  0x4d   : > { %583 = vmatpush3.bf16.msra.mxu0 %v582_v45  ;;  %602 = vmatpush3.bf16.msra.mxu1 %v582_v45 }
  0x4e   : > { %585 = vmatprep.subr.bf16.mxu0 %v584_v46  ;;  %595 = vmatprep.subr.bf16.mxu1 %v584_v46 }
  0x51   : > { %587 = vmatpush3.bf16.msra.mxu0 %v586_v49  ;;  %603 = vmatpush3.bf16.msra.mxu1 %v586_v49 }
  0x54   : > { %296 = vmatmul.mubr.f32.vlgmr.msra.gmra.mrb[0].mxu0 %v167_v50  ;;  %336 = vmatmul.mubr.f32.vlgmr.msra.gmra.mrb[0].mxu1 %v183_v51 }
  0x55   : > { %300 = vmatprep.mubr.f32.mxu0 %v170_v52  ;;  %340 = vmatprep.mubr.f32.mxu1 %v186_v53 }
  0x58   : > { %301 = vmatmul.mubr.f32.gmra.mrb[2].mxu0 %v169_v54  ;;  %341 = vmatmul.mubr.f32.gmra.mrb[2].mxu1 %v185_v55 }
  0x59   : > { %305 = vmatprep.mubr.f32.mxu0 %v172_v56  ;;  %345 = vmatprep.mubr.f32.mxu1 %v188_v57 }
  0x5c   : > { %306 = vmatmul.mubr.f32.gmra.mrb[4].mxu0 %v171_v58  ;;  %346 = vmatmul.mubr.f32.gmra.mrb[4].mxu1 %v187_v59 }
  0x5d   : > { %310 = vmatprep.mubr.f32.mxu0 %v174_v60  ;;  %350 = vmatprep.mubr.f32.mxu1 %v190_v61 }
  0x60   : > { %311 = vmatmul.mubr.f32.gmra.mrb[6].mxu0 %v173_v62  ;;  %351 = vmatmul.mubr.f32.gmra.mrb[6].mxu1 %v189_v63 }
  0x61   : > { %315 = vmatprep.mubr.f32.mxu0 %v176_v0  ;;  %355 = vmatprep.mubr.f32.mxu1 %v192_v1 }
  0x64   : > { %316 = vmatmul.mubr.f32.gmra.mrb[8].mxu0 %v175_v2  ;;  %356 = vmatmul.mubr.f32.gmra.mrb[8].mxu1 %v191_v3 }
  0x65   : > { %320 = vmatprep.mubr.f32.mxu0 %v178_v4  ;;  %360 = vmatprep.mubr.f32.mxu1 %v194_v5 }
  0x68   : > { %321 = vmatmul.mubr.f32.gmra.mrb[10].mxu0 %v177_v6  ;;  %361 = vmatmul.mubr.f32.gmra.mrb[10].mxu1 %v193_v7 }
  0x69   : > { %325 = vmatprep.mubr.f32.mxu0 %v180_v8  ;;  %365 = vmatprep.mubr.f32.mxu1 %v196_v9 }
  0x6c   : > { %326 = vmatmul.mubr.f32.gmra.mrb[12].mxu0 %v179_v10  ;;  %366 = vmatmul.mubr.f32.gmra.mrb[12].mxu1 %v195_v11 }
  0x6d   : > { %330 = vmatprep.mubr.f32.mxu0 %v182_v12  ;;  %370 = vmatprep.mubr.f32.mxu1 %v198_v13 }
  0x70   : > { %331 = vmatmul.mubr.f32.gmra.mrb[14].mxu0 %v181_v14  ;;  %371 = vmatmul.mubr.f32.gmra.mrb[14].mxu1 %v197_v15 }
 0x127   : > { %v508_v16 = vpop.f32.mrb[0].mxu0  ;;  %v532_v17 = vpop.f32.mrb[0].mxu1 }
 0x128   : > { %v509_v18 = vpop.f32.mrb[1].mxu0  ;;  %v533_v19 = vpop.f32.mrb[1].mxu1 }
 0x129   : > { %v510_v20 = vadd.f32 %v509_v18, %v508_v16  ;;  %v534_v21 = vadd.f32 %v533_v19, %v532_v17 }
 0x12b   : > { %377 = vst.msk [vmem:[%s953_s28] sm:$0xff] %vm376_vm0, %v510_v20  ;;  %385 = vst.msk [vmem:[%s953_s28 + $0x40] sm:$0xff] %vm376_vm0, %v534_v21  ;;  %v511_v22 = vpop.f32.mrb[2].mxu0  ;;  %v535_v23 = vpop.f32.mrb[2].mxu1 }
 0x12c   : > { %v512_v24 = vpop.f32.mrb[3].mxu0  ;;  %v536_v25 = vpop.f32.mrb[3].mxu1 }
 0x12d   : > { %v513_v26 = vadd.f32 %v512_v24, %v511_v22  ;;  %v537_v27 = vadd.f32 %v536_v25, %v535_v23 }
 0x12f   : > { %378 = vst.msk [vmem:[%s953_s28 + $0x8] sm:$0xff] %vm376_vm0, %v513_v26  ;;  %386 = vst.msk [vmem:[%s953_s28 + $0x48] sm:$0xff] %vm376_vm0, %v537_v27  ;;  %v514_v28 = vpop.f32.mrb[4].mxu0  ;;  %v538_v29 = vpop.f32.mrb[4].mxu1 }
 0x130   : > { %v515_v30 = vpop.f32.mrb[5].mxu0  ;;  %v539_v31 = vpop.f32.mrb[5].mxu1 }
 0x131   : > { %v516_v32 = vadd.f32 %v515_v30, %v514_v28  ;;  %v540_v33 = vadd.f32 %v539_v31, %v538_v29 }
 0x133   : > { %379 = vst.msk [vmem:[%s953_s28 + $0x10] sm:$0xff] %vm376_vm0, %v516_v32  ;;  %387 = vst.msk [vmem:[%s953_s28 + $0x50] sm:$0xff] %vm376_vm0, %v540_v33  ;;  %v517_v34 = vpop.f32.mrb[6].mxu0  ;;  %v541_v35 = vpop.f32.mrb[6].mxu1 }
 0x134   : > { %v518_v36 = vpop.f32.mrb[7].mxu0  ;;  %v542_v37 = vpop.f32.mrb[7].mxu1 }
 0x135   : > { %v519_v38 = vadd.f32 %v518_v36, %v517_v34  ;;  %v543_v39 = vadd.f32 %v542_v37, %v541_v35 }
 0x137   : > { %380 = vst.msk [vmem:[%s953_s28 + $0x18] sm:$0xff] %vm376_vm0, %v519_v38  ;;  %388 = vst.msk [vmem:[%s953_s28 + $0x58] sm:$0xff] %vm376_vm0, %v543_v39  ;;  %v520_v40 = vpop.f32.mrb[8].mxu0  ;;  %v544_v41 = vpop.f32.mrb[8].mxu1 }
 0x138   : > { %v521_v42 = vpop.f32.mrb[9].mxu0  ;;  %v545_v43 = vpop.f32.mrb[9].mxu1 }
 0x139   : > { %v522_v44 = vadd.f32 %v521_v42, %v520_v40  ;;  %v546_v45 = vadd.f32 %v545_v43, %v544_v41 }
 0x13b   : > { %381 = vst.msk [vmem:[%s953_s28 + $0x20] sm:$0xff] %vm376_vm0, %v522_v44  ;;  %389 = vst.msk [vmem:[%s953_s28 + $0x60] sm:$0xff] %vm376_vm0, %v546_v45  ;;  %v523_v46 = vpop.f32.mrb[10].mxu0  ;;  %v547_v47 = vpop.f32.mrb[10].mxu1 }
 0x13c   : > { %v524_v48 = vpop.f32.mrb[11].mxu0  ;;  %v548_v49 = vpop.f32.mrb[11].mxu1 }
 0x13d   : > { %v525_v50 = vadd.f32 %v524_v48, %v523_v46  ;;  %v549_v51 = vadd.f32 %v548_v49, %v547_v47 }
 0x13f   : > { %382 = vst.msk [vmem:[%s953_s28 + $0x28] sm:$0xff] %vm376_vm0, %v525_v50  ;;  %390 = vst.msk [vmem:[%s953_s28 + $0x68] sm:$0xff] %vm376_vm0, %v549_v51  ;;  %v526_v52 = vpop.f32.mrb[12].mxu0  ;;  %v550_v53 = vpop.f32.mrb[12].mxu1 }
 0x140   : > { %v527_v54 = vpop.f32.mrb[13].mxu0  ;;  %v551_v55 = vpop.f32.mrb[13].mxu1 }
 0x141   : > { %v528_v56 = vadd.f32 %v527_v54, %v526_v52  ;;  %v552_v57 = vadd.f32 %v551_v55, %v550_v53 }
 0x143   : > { %383 = vst.msk [vmem:[%s953_s28 + $0x30] sm:$0xff] %vm376_vm0, %v528_v56  ;;  %391 = vst.msk [vmem:[%s953_s28 + $0x70] sm:$0xff] %vm376_vm0, %v552_v57  ;;  %v529_v58 = vpop.f32.mrb[14].mxu0  ;;  %v553_v59 = vpop.f32.mrb[14].mxu1 }
 0x144   : > { %v530_v60 = vpop.f32.mrb[15].mxu0  ;;  %v554_v61 = vpop.f32.mrb[15].mxu1 }
 0x145   : > { %v531_v62 = vadd.f32 %v530_v60, %v529_v58  ;;  %v555_v63 = vadd.f32 %v554_v61, %v553_v59 }
 0x147   : > { %384 = vst.msk [vmem:[%s953_s28 + $0x38] sm:$0xff] %vm376_vm0, %v531_v62  ;;  %392 = vst.msk [vmem:[%s953_s28 + $0x78] sm:$0xff] %vm376_vm0, %v555_v63 }
 0x148 PF: > { %p12_p8 = scmp.ge.s32.totalorder %s749_s14, 4   ;;  %s1006_s9 = smov %s701_s10 }
 0x149   : > { %s1007_s10 = smov %s705_s11  ;;  %s1008_s11 = smov %s759_s17 }
 0x14a   : > { %s1009_s12 = smov %s749_s14  ;;  %14 = sbr.rel (!%p12_p8) target bundleno = 3 (0x3), region = 68 }
 0x151   :  { %415 = vsyncpa [#allocation3], 1 }
 0x152   :  { %417 = vsyncpa [#allocation3 + $0x1], 1 }

</bundles_post_ra>
